<compile_context>
chip_gen: v6e
topology: v6e:2x2x1
jax: 0.10.0
libtpu: 0.0.40
codegen_flags: <defaults>
</compile_context>

<pallas_src>
import functools

import jax
import jax.numpy as jnp
from jax import lax
from jax.experimental import pallas as pl
from jax.experimental.pallas import tpu as pltpu


def _fold_to(x, width):
    """Reduce the last (lane) axis down to `width` with full-width VPU adds.

    The lane width is always `width * 2**k` by construction, so every split is
    at a 128-aligned lane boundary and never touches the XLU.
    """
    w = x.shape[-1]
    while w > width:
        half = w // 2
        x = x[..., :half] + x[..., half:]
        w = half
    return x


def _dice_partial_kernel(p_ref, t_ref, num_out, den_out, num_acc, den_acc, *,
                         p_pow, d_s, tile_ds, chunk, n_chunks, acc_w,
                         k_per_par, n_kblocks, needs_mask, unroll):
    k_in = pl.program_id(2)                       # reduction axis (innermost)
    global_k = pl.program_id(0) * k_per_par + k_in  # global d_s-block index

    @pl.when(k_in == 0)
    def _():
        num_acc[...] = jnp.zeros_like(num_acc)
        den_acc[...] = jnp.zeros_like(den_acc)

    def contrib(c, carry, masked):
        num_c, den_c = carry
        off = c * chunk
        if not isinstance(off, int):
            off = pl.multiple_of(off, min(chunk, 128))
        pr = p_ref[:, :, pl.ds(off, chunk)].astype(jnp.float32)
        tg = t_ref[:, :, pl.ds(off, chunk)].astype(jnp.float32)
        prod = pr * tg
        if p_pow == 1:
            den_t = pr + tg
        elif p_pow == 2:
            den_t = pr * pr + tg * tg
        elif p_pow == 3:
            den_t = pr * pr * pr + tg * tg * tg
        elif p_pow == 4:
            pr2 = pr * pr
            tg2 = tg * tg
            den_t = pr2 * pr2 + tg2 * tg2
        else:  # genuinely non-integer exponent -> EUP pow
            den_t = pr ** p_pow + tg ** p_pow
        if masked:
            # Only the last global block is ragged; select zeroes OOB garbage
            # (incl. NaN/Inf) out of the contributions.
            lanes = lax.broadcasted_iota(jnp.int32, prod.shape, prod.ndim - 1)
            valid = (lanes + (global_k * tile_ds + off)) < d_s
            prod = jnp.where(valid, prod, 0.0)
            den_t = jnp.where(valid, den_t, 0.0)
        return num_c + _fold_to(prod, acc_w), den_c + _fold_to(den_t, acc_w)

    def accumulate(masked):
        zero = jnp.zeros(num_acc.shape, jnp.float32)
        carry = (zero, zero)
        if n_chunks == 1:
            carry = contrib(0, carry, masked)
        else:
            carry = lax.fori_loop(0, n_chunks,
                                  lambda c, cy: contrib(c, cy, masked),
                                  carry, unroll=unroll)
        num_acc[...] += carry[0]
        den_acc[...] += carry[1]

    if needs_mask:
        is_last = global_k == (n_kblocks - 1)

        @pl.when(jnp.logical_not(is_last))
        def _():
            accumulate(False)

        @pl.when(is_last)
        def _():
            accumulate(True)
    else:
        accumulate(False)

    @pl.when(k_in == pl.num_programs(2) - 1)
    def _():
        # One cross-sublane reduce per (par-slice, batch-block); lane-dense
        # (tile_n, acc_w) partial-sum stores; final combine is in the wrapper.
        num_out[...] = jnp.sum(num_acc[...], axis=1)
        den_out[...] = jnp.sum(den_acc[...], axis=1)


def binary_dice_loss(predict, target, smooth=1.0, p=2, reduction="mean"):
    assert predict.shape[0] == target.shape[0], \
        "predict & target batch size don't match"
    n = predict.shape[0]
    pred2d = predict.reshape(n, -1)
    targ2d = target.reshape(n, -1)
    d = pred2d.shape[1]

    # ---- sublane packing: view each row as (s, d//s), free reshape ----------
    small_item = min(jnp.dtype(pred2d.dtype).itemsize,
                     jnp.dtype(targ2d.dtype).itemsize)
    pack = {4: 8, 2: 16, 1: 32}.get(small_item, 8)
    s = 1
    for cand in range(pack, 0, -1):
        if d % cand == 0:
            s = cand
            break
    d_s = d // s
    pred3d = pred2d.reshape(n, s, d_s)
    targ3d = targ2d.reshape(n, s, d_s)

    # ---- batch tiling: keep the output sublane dim 8-aligned ----------------
    tile_n = n if n <= 8 else 8
    grid_n = pl.cdiv(n, tile_n)

    # ---- per-generation block budget -----------------------------------------
    try:
        vmem_cap = int(pltpu.get_tpu_info().vmem_capacity_bytes)
    except Exception:
        vmem_cap = 64 * 1024 * 1024  # conservative (v7x-sized)
    target_block_bytes = max(2 * 1024 * 1024,
                             min(8 * 1024 * 1024, vmem_cap // 8))

    big_item = max(jnp.dtype(pred2d.dtype).itemsize,
                   jnp.dtype(targ2d.dtype).itemsize)
    col_bytes = tile_n * max(s, 8) * big_item  # bytes per lane column, per input

    # ---- lane tiling: cheapest multiple of 128 within the byte budget -------
    if d_s <= 128:
        tile_ds = d_s  # full last dim -> always a legal block
    else:
        budget_lanes = max(128, (target_block_bytes // col_bytes) // 128 * 128)
        cap = max(128, min(budget_lanes, (d_s // 128) * 128))
        # cost ~ processed lanes + per-grid-step overhead (~1K-lane equivalent);
        # divisors of d_s (zero padded work) win; tie-break on larger blocks.
        tile_ds = min(range(128, cap + 1, 128),
                      key=lambda t: (pl.cdiv(d_s, t) * (t + 1024), -t))
    needs_mask = (d_s % tile_ds) != 0
    n_kblocks = pl.cdiv(d_s, tile_ds)
    acc_w = min(128, tile_ds)

    # ---- small-batch: split the reduction across a leading parallel axis ----
    grid_par = 2 if (grid_n == 1 and n_kblocks >= 2 and n_kblocks % 2 == 0) else 1
    k_per_par = n_kblocks // grid_par

    # ---- in-kernel chunking: keep intermediates in registers ----------------
    rows = tile_n * s
    if tile_ds <= 128:
        chunk = tile_ds
    else:
        chunk = 128
        while (chunk * 2 <= 1024 and rows * chunk * 2 <= 16 * 1024
               and tile_ds % (chunk * 2) == 0):
            chunk *= 2
    n_chunks = tile_ds // chunk
    unroll = min(n_chunks, 8) if n_chunks > 1 else 1

    kernel = functools.partial(
        _dice_partial_kernel, p_pow=p, d_s=d_s, tile_ds=tile_ds, chunk=chunk,
        n_chunks=n_chunks, acc_w=acc_w, k_per_par=k_per_par,
        n_kblocks=n_kblocks, needs_mask=needs_mask, unroll=unroll)

    block_bytes = tile_n * max(s, 8) * tile_ds * big_item
    vmem_limit = int(max(16 * 1024 * 1024,
                         min(0.75 * vmem_cap,
                             4 * block_bytes + 8 * 1024 * 1024)))

    pnum, pden = pl.pallas_call(
        kernel,
        out_shape=(jax.ShapeDtypeStruct((grid_par, n, acc_w), jnp.float32),
                   jax.ShapeDtypeStruct((grid_par, n, acc_w), jnp.float32)),
        grid_spec=pltpu.PrefetchScalarGridSpec(
            num_scalar_prefetch=0,
            grid=(grid_par, grid_n, k_per_par),
            in_specs=[
                pl.BlockSpec((tile_n, s, tile_ds),
                             lambda g, i, k: (i, 0, g * k_per_par + k)),
                pl.BlockSpec((tile_n, s, tile_ds),
                             lambda g, i, k: (i, 0, g * k_per_par + k)),
            ],
            out_specs=[
                pl.BlockSpec((None, tile_n, acc_w), lambda g, i, k: (g, i, 0)),
                pl.BlockSpec((None, tile_n, acc_w), lambda g, i, k: (g, i, 0)),
            ],
            scratch_shapes=[
                pltpu.VMEM((tile_n, s, acc_w), jnp.float32),
                pltpu.VMEM((tile_n, s, acc_w), jnp.float32),
            ],
        ),
        compiler_params=pltpu.CompilerParams(
            dimension_semantics=("parallel", "parallel", "arbitrary"),
            vmem_limit_bytes=vmem_limit,
        ),
    )(pred3d, targ3d)

    # Tiny wrapper-side combine of per-slice partial sums (O(n) work).
    num = jnp.sum(pnum, axis=(0, 2))
    den = jnp.sum(pden, axis=(0, 2))
    sm = jnp.float32(smooth)
    loss = 1.0 - (num + sm) / (den + sm)

    if reduction == "mean":
        return jnp.mean(loss)
    elif reduction == "sum":
        return jnp.sum(loss)
    elif reduction == "none":
        return loss
    else:
        raise Exception("Unexpected reduction {}".format(reduction))


def _reference(predict, target, smooth=1.0, p=2, reduction="mean"):
    n = predict.shape[0]
    pr = predict.reshape(n, -1).astype(jnp.float32)
    tg = target.reshape(n, -1).astype(jnp.float32)
    num = jnp.sum(pr * tg, axis=1) + smooth
    den = jnp.sum(pr ** p + tg ** p, axis=1) + smooth
    loss = 1.0 - num / den
    if reduction == "mean":
        return loss.mean()
    if reduction == "sum":
        return loss.sum()
    return loss


if __name__ == "__main__":
    key = jax.random.PRNGKey(0)
    k1, k2, k3, k4, k5, k6 = jax.random.split(key, 6)

    # Case 1 — NCHW like the PyTorch module: [N=2, C=4, H=16, W=16], 'mean'.
    predict = jax.nn.sigmoid(jax.random.normal(k1, (2, 4, 16, 16), jnp.float32))
    target = (jax.random.uniform(k2, (2, 4, 16, 16)) > 0.5).astype(jnp.float32)
    out = binary_dice_loss(predict, target, smooth=1.0, p=2, reduction="mean")
    out = jax.block_until_ready(out)
    ref = _reference(predict, target, smooth=1.0, p=2, reduction="mean")
    assert jnp.allclose(out, ref, atol=2e-5, rtol=2e-5), (out, ref)

    # Case 2 — ragged lane tail + reduction split across the parallel axis
    # + 'none': D = 1*32*100 = 3200 -> d_s = 400, tile_ds = 256 (masked tail).
    predict2 = jax.nn.sigmoid(jax.random.normal(k3, (3, 1, 32, 100), jnp.float32))
    target2 = (jax.random.uniform(k4, (3, 1, 32, 100)) > 0.5).astype(jnp.float32)
    out2 = binary_dice_loss(predict2, target2, smooth=1.0, p=2, reduction="none")
    out2 = jax.block_until_ready(out2)
    ref2 = _reference(predict2, target2, smooth=1.0, p=2, reduction="none")
    assert jnp.allclose(out2, ref2, atol=2e-5, rtol=2e-5), (out2, ref2)

    # Case 3 — ragged batch (n=10, tile_n=8), chunked inner loop, 'sum'.
    predict3 = jax.nn.sigmoid(jax.random.normal(k5, (10, 4, 32, 32), jnp.float32))
    target3 = (jax.random.uniform(k6, (10, 4, 32, 32)) > 0.5).astype(jnp.float32)
    out3 = binary_dice_loss(predict3, target3, smooth=1.0, p=2, reduction="sum")
    out3 = jax.block_until_ready(out3)
    ref3 = _reference(predict3, target3, smooth=1.0, p=2, reduction="sum")
    assert jnp.allclose(out3, ref3, atol=2e-5, rtol=2e-5), (out3, ref3)

    print("KERNEL_OK")
</pallas_src>

<mosaic_0001>
module attributes {stable_mosaic.version = 11 : i64} {
  func.func @_dice_partial_kernel(%arg0: i32, %arg1: i32, %arg2: i32, %arg3: memref<2x8x128xf32, #tpu.memory_space<vmem>>, %arg4: memref<2x8x128xf32, #tpu.memory_space<vmem>>, %arg5: memref<1x2x128xf32, #tpu.memory_space<vmem>>, %arg6: memref<1x2x128xf32, #tpu.memory_space<vmem>>, %arg7: memref<2x8x128xf32, #tpu.memory_space<vmem>>, %arg8: memref<2x8x128xf32, #tpu.memory_space<vmem>>) attributes {dimension_semantics = [#tpu.dimension_semantics<parallel>, #tpu.dimension_semantics<parallel>, #tpu.dimension_semantics<arbitrary>], iteration_bounds = array<i64: 1, 1, 1>, scalar_prefetch = 0 : i64, scratch_operands = 2 : i64, tpu.core_type = #tpu.core_type<tc>, window_params = [{transform_indices = @transform_0, window_bounds = array<i64: 2, 8, 128>}, {transform_indices = @transform_1, window_bounds = array<i64: 2, 8, 128>}, {transform_indices = @transform_2, window_bounds = array<i64: 1, 2, 128>}, {transform_indices = @transform_3, window_bounds = array<i64: 1, 2, 128>}]} {
    %c0_i32 = arith.constant 0 : i32
    %0 = arith.cmpi eq, %arg2, %c0_i32 : i32
    %1 = arith.extui %0 : i1 to i32
    %c0_i32_0 = arith.constant 0 : i32
    %2 = arith.cmpi ne, %1, %c0_i32_0 : i32
    scf.if %2 {
      %cst_20 = arith.constant 0.000000e+00 : f32
      %21 = vector.broadcast %cst_20 : f32 to vector<2x8x128xf32>
      %c0_21 = arith.constant 0 : index
      %c0_22 = arith.constant 0 : index
      %c0_23 = arith.constant 0 : index
      %22 = vector.load %arg7[%c0_21, %c0_22, %c0_23] : memref<2x8x128xf32, #tpu.memory_space<vmem>>, vector<2x8x128xf32>
      tpu.vector_store %arg7[%c0_21, %c0_22, %c0_23], %21 {strides = array<i32>} : memref<2x8x128xf32, #tpu.memory_space<vmem>>, vector<2x8x128xf32>,
      %cst_24 = arith.constant 0.000000e+00 : f32
      %23 = vector.broadcast %cst_24 : f32 to vector<2x8x128xf32>
      %c0_25 = arith.constant 0 : index
      %c0_26 = arith.constant 0 : index
      %c0_27 = arith.constant 0 : index
      %24 = vector.load %arg8[%c0_25, %c0_26, %c0_27] : memref<2x8x128xf32, #tpu.memory_space<vmem>>, vector<2x8x128xf32>
      tpu.vector_store %arg8[%c0_25, %c0_26, %c0_27], %23 {strides = array<i32>} : memref<2x8x128xf32, #tpu.memory_space<vmem>>, vector<2x8x128xf32>,
    } else {
    }
    %cst = arith.constant 0.000000e+00 : f32
    %3 = vector.broadcast %cst : f32 to vector<2x8x128xf32>
    %c0 = arith.constant 0 : index
    %c0_1 = arith.constant 0 : index
    %c0_2 = arith.constant 0 : index
    %4 = vector.load %arg3[%c0, %c0_1, %c0_2] : memref<2x8x128xf32, #tpu.memory_space<vmem>>, vector<2x8x128xf32>
    %c0_3 = arith.constant 0 : index
    %c0_4 = arith.constant 0 : index
    %c0_5 = arith.constant 0 : index
    %5 = vector.load %arg4[%c0_3, %c0_4, %c0_5] : memref<2x8x128xf32, #tpu.memory_space<vmem>>, vector<2x8x128xf32>
    %6 = arith.mulf %4, %5 : vector<2x8x128xf32>
    %7 = arith.mulf %4, %4 : vector<2x8x128xf32>
    %8 = arith.mulf %5, %5 : vector<2x8x128xf32>
    %9 = arith.addf %7, %8 : vector<2x8x128xf32>
    %10 = arith.addf %3, %6 : vector<2x8x128xf32>
    %11 = arith.addf %3, %9 : vector<2x8x128xf32>
    %c0_6 = arith.constant 0 : index
    %c0_7 = arith.constant 0 : index
    %c0_8 = arith.constant 0 : index
    %12 = vector.load %arg7[%c0_6, %c0_7, %c0_8] : memref<2x8x128xf32, #tpu.memory_space<vmem>>, vector<2x8x128xf32>
    %13 = arith.addf %12, %10 : vector<2x8x128xf32>
    %c0_9 = arith.constant 0 : index
    %c0_10 = arith.constant 0 : index
    %c0_11 = arith.constant 0 : index
    %14 = vector.load %arg7[%c0_9, %c0_10, %c0_11] : memref<2x8x128xf32, #tpu.memory_space<vmem>>, vector<2x8x128xf32>
    tpu.vector_store %arg7[%c0_9, %c0_10, %c0_11], %13 {strides = array<i32>} : memref<2x8x128xf32, #tpu.memory_space<vmem>>, vector<2x8x128xf32>,
    %c0_12 = arith.constant 0 : index
    %c0_13 = arith.constant 0 : index
    %c0_14 = arith.constant 0 : index
    %15 = vector.load %arg8[%c0_12, %c0_13, %c0_14] : memref<2x8x128xf32, #tpu.memory_space<vmem>>, vector<2x8x128xf32>
    %16 = arith.addf %15, %11 : vector<2x8x128xf32>
    %c0_15 = arith.constant 0 : index
    %c0_16 = arith.constant 0 : index
    %c0_17 = arith.constant 0 : index
    %17 = vector.load %arg8[%c0_15, %c0_16, %c0_17] : memref<2x8x128xf32, #tpu.memory_space<vmem>>, vector<2x8x128xf32>
    tpu.vector_store %arg8[%c0_15, %c0_16, %c0_17], %16 {strides = array<i32>} : memref<2x8x128xf32, #tpu.memory_space<vmem>>, vector<2x8x128xf32>,
    %c0_i32_18 = arith.constant 0 : i32
    %18 = arith.cmpi eq, %arg2, %c0_i32_18 : i32
    %19 = arith.extui %18 : i1 to i32
    %c0_i32_19 = arith.constant 0 : i32
    %20 = arith.cmpi ne, %19, %c0_i32_19 : i32
    scf.if %20 {
      %c0_20 = arith.constant 0 : index
      %c0_21 = arith.constant 0 : index
      %c0_22 = arith.constant 0 : index
      %21 = vector.load %arg7[%c0_20, %c0_21, %c0_22] : memref<2x8x128xf32, #tpu.memory_space<vmem>>, vector<2x8x128xf32>
      %cst_23 = arith.constant dense<0.000000e+00> : vector<2x128xf32>
      %22 = vector.multi_reduction <add>, %21, %cst_23 [1] : vector<2x8x128xf32> to vector<2x128xf32>
      %c0_24 = arith.constant 0 : index
      %c0_25 = arith.constant 0 : index
      %c0_26 = arith.constant 0 : index
      %23 = vector.load %arg5[%c0_24, %c0_25, %c0_26] : memref<1x2x128xf32, #tpu.memory_space<vmem>>, vector<1x2x128xf32>
      %24 = vector.shape_cast %23 : vector<1x2x128xf32> to vector<2x128xf32>
      %25 = vector.shape_cast %22 : vector<2x128xf32> to vector<1x2x128xf32>
      tpu.vector_store %arg5[%c0_24, %c0_25, %c0_26], %25 {strides = array<i32>} : memref<1x2x128xf32, #tpu.memory_space<vmem>>, vector<1x2x128xf32>,
      %c0_27 = arith.constant 0 : index
      %c0_28 = arith.constant 0 : index
      %c0_29 = arith.constant 0 : index
      %26 = vector.load %arg8[%c0_27, %c0_28, %c0_29] : memref<2x8x128xf32, #tpu.memory_space<vmem>>, vector<2x8x128xf32>
      %cst_30 = arith.constant dense<0.000000e+00> : vector<2x128xf32>
      %27 = vector.multi_reduction <add>, %26, %cst_30 [1] : vector<2x8x128xf32> to vector<2x128xf32>
      %c0_31 = arith.constant 0 : index
      %c0_32 = arith.constant 0 : index
      %c0_33 = arith.constant 0 : index
      %28 = vector.load %arg6[%c0_31, %c0_32, %c0_33] : memref<1x2x128xf32, #tpu.memory_space<vmem>>, vector<1x2x128xf32>
      %29 = vector.shape_cast %28 : vector<1x2x128xf32> to vector<2x128xf32>
      %30 = vector.shape_cast %27 : vector<2x128xf32> to vector<1x2x128xf32>
      tpu.vector_store %arg6[%c0_31, %c0_32, %c0_33], %30 {strides = array<i32>} : memref<1x2x128xf32, #tpu.memory_space<vmem>>, vector<1x2x128xf32>,
    } else {
    }
    return
  }
  func.func @transform_0(%arg0: i32, %arg1: i32, %arg2: i32) -> (i32, i32, i32) {
    %c1_i32 = arith.constant 1 : i32
    %0 = arith.muli %arg0, %c1_i32 : i32
    %1 = arith.addi %0, %arg2 : i32
    %c0_i32 = arith.constant 0 : i32
    %c0_i32_0 = arith.constant 0 : i32
    return %arg1, %c0_i32, %1 : i32, i32, i32
  }
  func.func @transform_1(%arg0: i32, %arg1: i32, %arg2: i32) -> (i32, i32, i32) {
    %c1_i32 = arith.constant 1 : i32
    %0 = arith.muli %arg0, %c1_i32 : i32
    %1 = arith.addi %0, %arg2 : i32
    %c0_i32 = arith.constant 0 : i32
    %c0_i32_0 = arith.constant 0 : i32
    return %arg1, %c0_i32, %1 : i32, i32, i32
  }
  func.func @transform_2(%arg0: i32, %arg1: i32, %arg2: i32) -> (i32, i32, i32) {
    %c0_i32 = arith.constant 0 : i32
    %c0_i32_0 = arith.constant 0 : i32
    return %arg0, %arg1, %c0_i32 : i32, i32, i32
  }
  func.func @transform_3(%arg0: i32, %arg1: i32, %arg2: i32) -> (i32, i32, i32) {
    %c0_i32 = arith.constant 0 : i32
    %c0_i32_0 = arith.constant 0 : i32
    return %arg0, %arg1, %c0_i32 : i32, i32, i32
  }
}

</mosaic_0001>

<bundles_post_ra>
// kernel: tpu_custom_call.1
= control target key start
LH: loop header
LB: loop body
LE: loop exit
PB: predicated region body
PF: predicated region fallthrough
CT: control target
= control target key end

     0   :  { %9 = vsyncpa [#allocation5], 0  ;;  %s291_s0 = inlined_call_operand.hbm [shape: f32[2,8,128], index: 0, kind: input, shape index: {}]   ;;  %s292_s1 = inlined_call_operand.hbm [shape: f32[2,8,128], index: 1, kind: input, shape index: {}]   ;;  %s293_s2 = inlined_call_operand.hbm [shape: f32[1,2,128], index: 2, kind: output, shape index: {0}]   ;;  %s294_s3 = inlined_call_operand.hbm [shape: f32[1,2,128], index: 3, kind: output, shape index: {1}]  }
   0x1   :  { %10 = vsyncpa [#allocation8], 0 }
   0x2   :  { %11 = vsyncpa [#allocation6], 0 }
   0x3   :  { %12 = vsyncpa [#allocation11], 0  ;;  %s253_s12 = smov [#allocation4]  }
   0x4   :  { %s21_s13 = sshll.u32 %s253_s12, 4  ;;  %s22_s13 = int_to_ptr.vmem [resolvable:$true] %s21_s13 }
   0x5   :  { %s173_s14 = scalar_lea.vmem %s22_s13, 256  ;;  %p178_p1 = scmp.lt.s32.totalorder %s22_s13, %s22_s13 }
   0x6   :  { %p174_p0 = scmp.ne.s32.totalorder %s22_s13, %s173_s14  ;;  %p179_p2 = scmp.lt.s32.totalorder %s173_s14, %s173_s14 }
   0x8   :  { %p180_p3 = por %p179_p2, %p178_p1 }
   0xa   :  { %p181_p4 = pnand %p180_p3, %p174_p0 }
   0xc   :  { %184 = shalt.err (!%p181_p4)
}
   0xd   :  { %s254_s15 = smov 128   ;;  %s255_s16 = smov 8  }
   0xe   :  { %27 = dma.hbm_to_vmem [thread:$0]  %s291_s0, 256, %s22_s13, [#allocation5], %s254_s15, %s254_s15, %s255_s16  }
   0xf   :  { %s256_s19 = smov [#allocation7]  }
  0x10   :  { %s36_s20 = sshll.u32 %s256_s19, 4  ;;  %s37_s20 = int_to_ptr.vmem [resolvable:$true] %s36_s20 }
  0x11   :  { %s193_s21 = scalar_lea.vmem %s37_s20, 256  ;;  %p198_p6 = scmp.lt.s32.totalorder %s37_s20, %s37_s20 }
  0x12   :  { %p194_p5 = scmp.ne.s32.totalorder %s37_s20, %s193_s21  ;;  %p199_p7 = scmp.lt.s32.totalorder %s193_s21, %s193_s21 }
  0x14   :  { %p200_p8 = por %p199_p7, %p198_p6 }
  0x16   :  { %p201_p9 = pnand %p200_p8, %p194_p5 }
  0x18   :  { %204 = shalt.err (!%p201_p9)
}
  0x19   :  { %42 = dma.hbm_to_vmem [thread:$0]  %s292_s1, 256, %s37_s20, [#allocation8], %s254_s15, %s254_s15, %s255_s16  }
  0x1a   :  { %245 = dma.done.wait [#allocation5], 256  }
  0x1b   :  { %246 = vsyncadd [#allocation5], 4294967040 }
  0x1c   :  { %247 = dma.done.wait [#allocation8], 256  }
  0x1d   :  { %248 = vsyncadd [#allocation8], 4294967040  ;;  %v59_v0 = vld [vmem:[#allocation4] sm:$0xff]  ;;  %v60_v1 = vld [vmem:[#allocation4 + $0x8] sm:$0xff]  ;;  %s257_s0 = smov [#allocation9]   ;;  %vm106_vm0 = vcmask 1041409  }
  0x1e   :  { %v61_v2 = vld [vmem:[#allocation7] sm:$0xff]  ;;  %v62_v3 = vld [vmem:[#allocation7 + $0x8] sm:$0xff]  ;;  %v65_v5 = vmul.f32 %v59_v0, %v59_v0  ;;  %v66_v6 = vmul.f32 %v60_v1, %v60_v1  ;;  %s135_s1 = sshll.u32 %s257_s0, 4  ;;  %s258_s24 = smov [#allocation10]   ;;  %s136_s1 = int_to_ptr.vmem [resolvable:$true] %s135_s1 }
  0x1f   :  { %v63_v4 = vmul.f32 %v61_v2, %v59_v0  ;;  %v67_v7 = vmul.f32 %v61_v2, %v61_v2  ;;  %v64_v8 = vmul.f32 %v62_v3, %v60_v1  ;;  %v68_v9 = vmul.f32 %v62_v3, %v62_v3  ;;  %s145_s25 = sshll.u32 %s258_s24, 4  ;;  %s205_s26 = scalar_lea.vmem %s136_s1, 32  ;;  %s146_s25 = int_to_ptr.vmem [resolvable:$true] %s145_s25 }
  0x20   :  { %p206_p10 = scmp.ne.s32.totalorder %s136_s1, %s205_s26  ;;  %p210_p11 = scmp.lt.s32.totalorder %s136_s1, %s136_s1 }
  0x21   :  { %v92_v10 = vrot.slane %v63_v4, 4  ;;  %v69_v11 = vadd.f32 %v67_v7, %v65_v5  ;;  %v98_v12 = vrot.slane %v64_v8, 4  ;;  %v70_v13 = vadd.f32 %v68_v9, %v66_v6  ;;  %p211_p12 = scmp.lt.s32.totalorder %s205_s26, %s205_s26 }
  0x23   :  { %v93_v14 = vadd.f32 %v92_v10, %v63_v4  ;;  %v112_v15 = vrot.slane %v69_v11, 4  ;;  %v99_v16 = vadd.f32 %v98_v12, %v64_v8  ;;  %v118_v17 = vrot.slane %v70_v13, 4  ;;  %p212_p13 = por %p211_p12, %p210_p11 }
  0x25   :  { %v94_v18 = vrot.slane %v93_v14, 2  ;;  %v113_v19 = vadd.f32 %v112_v15, %v69_v11  ;;  %v100_v20 = vrot.slane %v99_v16, 2  ;;  %v119_v21 = vadd.f32 %v118_v17, %v70_v13  ;;  %p213_p0 = pnand %p212_p13, %p206_p10 }
  0x27   :  { %v95_v22 = vadd.f32 %v94_v18, %v93_v14  ;;  %v114_v23 = vrot.slane %v113_v19, 2  ;;  %v101_v24 = vadd.f32 %v100_v20, %v99_v16  ;;  %v120_v25 = vrot.slane %v119_v21, 2 }
  0x29   :  { %v96_v26 = vrot.slane %v95_v22, 1  ;;  %v115_v27 = vadd.f32 %v114_v23, %v113_v19  ;;  %v102_v28 = vrot.slane %v101_v24, 1  ;;  %v121_v29 = vadd.f32 %v120_v25, %v119_v21 }
  0x2b   :  { %v97_v30 = vadd.f32 %v96_v26, %v95_v22  ;;  %v116_v31 = vrot.slane %v115_v27, 1  ;;  %v103_v32 = vadd.f32 %v102_v28, %v101_v24  ;;  %v122_v33 = vrot.slane %v121_v29, 1 }
  0x2d   :  { %v117_v34 = vadd.f32 %v116_v31, %v115_v27  ;;  %v107_v35 = vsel %vm106_vm0, %v103_v32, %v97_v30  ;;  %v123_v36 = vadd.f32 %v122_v33, %v121_v29 }
  0x2e   :  { %109 = vst [vmem:[#allocation9] sm:$0x3] %v107_v35 }
  0x2f   :  { %v126_v37 = vsel %vm106_vm0, %v123_v36, %v117_v34 }
  0x30   :  { %216 = shalt.err (!%p213_p0)
}
  0x31   :  { %138 = dma.vmem_to_hbm [thread:$0]  %s136_s1, 32, %s293_s2, [#allocation6]   ;;  %128 = vst [vmem:[#allocation10] sm:$0x3] %v126_v37 }
  0x32   :  { %s225_s29 = scalar_lea.vmem %s146_s25, 32  ;;  %p230_p2 = scmp.lt.s32.totalorder %s146_s25, %s146_s25 }
  0x33   :  { %p226_p1 = scmp.ne.s32.totalorder %s146_s25, %s225_s29  ;;  %p231_p3 = scmp.lt.s32.totalorder %s225_s29, %s225_s29 }
  0x35   :  { %p232_p4 = por %p231_p3, %p230_p2 }
  0x37   :  { %p233_p5 = pnand %p232_p4, %p226_p1 }
  0x39   :  { %236 = shalt.err (!%p233_p5)
}
  0x3a   :  { %148 = dma.vmem_to_hbm [thread:$0]  %s146_s25, 32, %s294_s3, [#allocation11]  }
  0x3b   :  { %249 = dma.done.wait [#allocation6], 32  }
  0x3c   :  { %250 = vsyncadd [#allocation6], 4294967264 }
  0x3d   :  { %251 = dma.done.wait [#allocation11], 32  }
  0x3e   :  { %252 = vsyncadd [#allocation11], 4294967264 }
  0x3f   :  { %155 = vsyncpa [#allocation5], 1 }
  0x40   :  { %156 = vsyncpa [#allocation8], 1 }
  0x41   :  { %157 = vsyncpa [#allocation6], 1 }
  0x42   :  { %158 = vsyncpa [#allocation11], 1 }

</bundles_post_ra>
